<compile_context>
chip_gen: v5e
topology: v5e:2x2
jax: 0.10.0
libtpu: 0.0.40
codegen_flags: <defaults>
</compile_context>

<pallas_src>
import functools

import jax
import jax.numpy as jnp
import numpy as np
from jax.experimental import pallas as pl
from jax.experimental.pallas import tpu as pltpu


_MT_MAX = 512  # sublane rows per tile (512 x 128 x 4 B = 256 KiB per input block)


def _round_up(x, m):
    return (x + m - 1) // m * m


def _pick_tiles(m_rows):
    """Pick (Mt, Mp): tile rows (sublane dim) and possibly padded total rows."""
    if m_rows <= _MT_MAX:
        return m_rows, m_rows                      # single tile == full dim
    for mt in range(_MT_MAX, 7, -8):               # multiples of 8 only
        if m_rows % mt == 0:
            return mt, m_rows                      # exact divisor, no padding
    return _MT_MAX, _round_up(m_rows, _MT_MAX)     # rare: pad rows up


def _make_soft_dice_kernel(smooth):
    smooth = float(smooth)

    def kernel(cmap_ref, o_ref, t_ref, dice_ref, inter_acc, union_acc):
        del cmap_ref  # only consumed by the index_maps
        n = pl.program_id(1)
        m = pl.program_id(2)
        first = (n == 0) & (m == 0)
        last = (n == pl.num_programs(1) - 1) & (m == pl.num_programs(2) - 1)

        @pl.when(first)
        def _init():
            inter_acc[...] = jnp.zeros_like(inter_acc)
            union_acc[...] = jnp.zeros_like(union_acc)

        # Elementwise (VPU) accumulation per tile; cast to f32 in-kernel so
        # narrow input dtypes (bf16 logits, int8 masks) stream at full rate.
        o = o_ref[...].astype(jnp.float32)          # (1, 1, Mt, 128)
        t = t_ref[...].astype(jnp.float32)
        inter_acc[...] += o * t
        union_acc[...] += o + t

        @pl.when(last)
        def _finalize():
            inter = jnp.sum(inter_acc[...])         # one XLU reduce / channel
            union = jnp.sum(union_acc[...])
            dice = 1.0 - (2.0 * inter + smooth) / (union + smooth)
            dice_ref[...] = jnp.broadcast_to(dice, dice_ref.shape)

    return kernel


@functools.partial(jax.jit, static_argnames=("ignore_index", "smooth", "reduction"))
def soft_dice_loss(output, target, *, ignore_index=None, smooth=1.0,
                   reduction='mean'):
    assert output.shape == target.shape
    shape = output.shape
    N, C = int(shape[0]), int(shape[1])
    K = int(np.prod(shape[2:])) if len(shape) > 2 else 1

    # Active channels: the ignored channel is never fetched from HBM.
    if ignore_index is not None and 0 <= ignore_index < C:
        chans = [c for c in range(C) if c != ignore_index]
    else:
        chans = list(range(C))
    n_count = len(chans)
    if n_count == 0:
        # PyTorch would divide 0.0 by 0 here; return 0 instead of nan/crash.
        return jnp.float32(0.0)
    chan_map = jnp.asarray(chans, dtype=jnp.int32)

    # Free reshape NCHW -> (N, C, K); pad the flat axis only when necessary.
    o = output.reshape(N, C, K)
    t = target.reshape(N, C, K)
    M = _round_up(K, 128) // 128
    Mt, Mp = _pick_tiles(M)
    Kp = Mp * 128
    if Kp != K:
        # Zero padding is exact: contributes 0 to inter and to both sums.
        pad = ((0, 0), (0, 0), (0, Kp - K))
        o = jnp.pad(o, pad)
        t = jnp.pad(t, pad)
    o = o.reshape(N, C, Mp, 128)
    t = t.reshape(N, C, Mp, 128)

    kernel = _make_soft_dice_kernel(smooth)
    grid = (n_count, N, Mp // Mt)

    grid_spec = pltpu.PrefetchScalarGridSpec(
        num_scalar_prefetch=1,
        grid=grid,
        in_specs=[
            pl.BlockSpec((1, 1, Mt, 128),
                         lambda ci, n, m, cmap: (n, cmap[ci], m, 0)),
            pl.BlockSpec((1, 1, Mt, 128),
                         lambda ci, n, m, cmap: (n, cmap[ci], m, 0)),
        ],
        out_specs=pl.BlockSpec((1, 8, 128), lambda ci, n, m, cmap: (ci, 0, 0)),
        scratch_shapes=[
            pltpu.VMEM((1, 1, Mt, 128), jnp.float32),   # inter accumulator
            pltpu.VMEM((1, 1, Mt, 128), jnp.float32),   # union accumulator
        ],
    )

    dice = pl.pallas_call(
        kernel,
        out_shape=jax.ShapeDtypeStruct((n_count, 8, 128), jnp.float32),
        grid_spec=grid_spec,
        compiler_params=pltpu.CompilerParams(
            dimension_semantics=("parallel", "arbitrary", "arbitrary")),
    )(chan_map, o, t)

    loss = jnp.sum(dice[:, 0, 0])
    if reduction == 'mean':
        loss = loss / n_count
    return loss


def _reference_soft_dice(output, target, ignore_index=None, smooth=1.0,
                         reduction='mean'):
    """Pure-JAX mirror of the PyTorch forward for verification."""
    C = output.shape[1]
    loss = 0.0
    n_count = 0
    for i in range(C):
        if ignore_index is not None and i == ignore_index:
            continue
        os_ = output[:, i].reshape(output.shape[0], -1).astype(jnp.float32)
        ts_ = target[:, i].reshape(target.shape[0], -1).astype(jnp.float32)
        inter = jnp.sum(os_ * ts_)
        union = jnp.sum(os_) + jnp.sum(ts_)
        loss += 1.0 - (2.0 * inter + smooth) / (union + smooth)
        n_count += 1
    if reduction == 'mean':
        loss = loss / n_count
    return loss


if __name__ == "__main__":
    key = jax.random.PRNGKey(0)
    k1, k2 = jax.random.split(key)

    # NCHW, matching the PyTorch module's expected layout.
    output = jax.random.uniform(k1, (2, 4, 16, 16), dtype=jnp.float32)
    target = (jax.random.uniform(k2, (2, 4, 16, 16)) > 0.5).astype(jnp.float32)

    # Default: mean reduction, no ignore_index.
    loss = soft_dice_loss(output, target, ignore_index=None, smooth=1.0,
                          reduction='mean')
    loss = jax.block_until_ready(loss)
    ref = _reference_soft_dice(output, target, None, 1.0, 'mean')
    np.testing.assert_allclose(np.asarray(loss), np.asarray(ref),
                               rtol=1e-5, atol=1e-5)

    # Also exercise the ignore_index path (ignored channel is never streamed).
    loss_ig = soft_dice_loss(output, target, ignore_index=1, smooth=1.0,
                             reduction='mean')
    loss_ig = jax.block_until_ready(loss_ig)
    ref_ig = _reference_soft_dice(output, target, 1, 1.0, 'mean')
    np.testing.assert_allclose(np.asarray(loss_ig), np.asarray(ref_ig),
                               rtol=1e-5, atol=1e-5)

    print("KERNEL_OK")
</pallas_src>

<mosaic_0001>
module attributes {stable_mosaic.version = 11 : i64} {
  func.func @kernel(%arg0: i32, %arg1: i32, %arg2: i32, %arg3: memref<4xi32, #tpu.memory_space<smem>>, %arg4: memref<1x1x2x128xf32, #tpu.memory_space<vmem>>, %arg5: memref<1x1x2x128xf32, #tpu.memory_space<vmem>>, %arg6: memref<1x8x128xf32, #tpu.memory_space<vmem>>, %arg7: memref<1x1x2x128xf32, #tpu.memory_space<vmem>>, %arg8: memref<1x1x2x128xf32, #tpu.memory_space<vmem>>) attributes {dimension_semantics = [#tpu.dimension_semantics<parallel>, #tpu.dimension_semantics<arbitrary>, #tpu.dimension_semantics<arbitrary>], iteration_bounds = array<i64: 4, 2, 1>, scalar_prefetch = 1 : i64, scratch_operands = 2 : i64, tpu.core_type = #tpu.core_type<tc>, window_params = [{transform_indices = @transform_0, window_bounds = array<i64: 1, 1, 2, 128>}, {transform_indices = @transform_1, window_bounds = array<i64: 1, 1, 2, 128>}, {transform_indices = @transform_2, window_bounds = array<i64: 1, 8, 128>}]} {
    %c0_i32 = arith.constant 0 : i32
    %0 = arith.cmpi eq, %arg1, %c0_i32 : i32
    %c0_i32_0 = arith.constant 0 : i32
    %1 = arith.cmpi eq, %arg2, %c0_i32_0 : i32
    %2 = arith.andi %0, %1 : i1
    %c1_i32 = arith.constant 1 : i32
    %3 = arith.cmpi eq, %arg1, %c1_i32 : i32
    %c0_i32_1 = arith.constant 0 : i32
    %4 = arith.cmpi eq, %arg2, %c0_i32_1 : i32
    %5 = arith.andi %3, %4 : i1
    %6 = arith.extui %2 : i1 to i32
    %c0_i32_2 = arith.constant 0 : i32
    %7 = arith.cmpi ne, %6, %c0_i32_2 : i32
    scf.if %7 {
      %cst = arith.constant 0.000000e+00 : f32
      %20 = vector.broadcast %cst : f32 to vector<1x1x2x128xf32>
      %c0_27 = arith.constant 0 : index
      %c0_28 = arith.constant 0 : index
      %c0_29 = arith.constant 0 : index
      %c0_30 = arith.constant 0 : index
      %21 = vector.load %arg7[%c0_27, %c0_28, %c0_29, %c0_30] : memref<1x1x2x128xf32, #tpu.memory_space<vmem>>, vector<1x1x2x128xf32>
      tpu.vector_store %arg7[%c0_27, %c0_28, %c0_29, %c0_30], %20 {strides = array<i32>} : memref<1x1x2x128xf32, #tpu.memory_space<vmem>>, vector<1x1x2x128xf32>,
      %cst_31 = arith.constant 0.000000e+00 : f32
      %22 = vector.broadcast %cst_31 : f32 to vector<1x1x2x128xf32>
      %c0_32 = arith.constant 0 : index
      %c0_33 = arith.constant 0 : index
      %c0_34 = arith.constant 0 : index
      %c0_35 = arith.constant 0 : index
      %23 = vector.load %arg8[%c0_32, %c0_33, %c0_34, %c0_35] : memref<1x1x2x128xf32, #tpu.memory_space<vmem>>, vector<1x1x2x128xf32>
      tpu.vector_store %arg8[%c0_32, %c0_33, %c0_34, %c0_35], %22 {strides = array<i32>} : memref<1x1x2x128xf32, #tpu.memory_space<vmem>>, vector<1x1x2x128xf32>,
    } else {
    }
    %c0 = arith.constant 0 : index
    %c0_3 = arith.constant 0 : index
    %c0_4 = arith.constant 0 : index
    %c0_5 = arith.constant 0 : index
    %8 = vector.load %arg4[%c0, %c0_3, %c0_4, %c0_5] : memref<1x1x2x128xf32, #tpu.memory_space<vmem>>, vector<1x1x2x128xf32>
    %c0_6 = arith.constant 0 : index
    %c0_7 = arith.constant 0 : index
    %c0_8 = arith.constant 0 : index
    %c0_9 = arith.constant 0 : index
    %9 = vector.load %arg5[%c0_6, %c0_7, %c0_8, %c0_9] : memref<1x1x2x128xf32, #tpu.memory_space<vmem>>, vector<1x1x2x128xf32>
    %c0_10 = arith.constant 0 : index
    %c0_11 = arith.constant 0 : index
    %c0_12 = arith.constant 0 : index
    %c0_13 = arith.constant 0 : index
    %10 = vector.load %arg7[%c0_10, %c0_11, %c0_12, %c0_13] : memref<1x1x2x128xf32, #tpu.memory_space<vmem>>, vector<1x1x2x128xf32>
    %11 = arith.mulf %8, %9 : vector<1x1x2x128xf32>
    %12 = arith.addf %10, %11 : vector<1x1x2x128xf32>
    %c0_14 = arith.constant 0 : index
    %c0_15 = arith.constant 0 : index
    %c0_16 = arith.constant 0 : index
    %c0_17 = arith.constant 0 : index
    %13 = vector.load %arg7[%c0_14, %c0_15, %c0_16, %c0_17] : memref<1x1x2x128xf32, #tpu.memory_space<vmem>>, vector<1x1x2x128xf32>
    tpu.vector_store %arg7[%c0_14, %c0_15, %c0_16, %c0_17], %12 {strides = array<i32>} : memref<1x1x2x128xf32, #tpu.memory_space<vmem>>, vector<1x1x2x128xf32>,
    %c0_18 = arith.constant 0 : index
    %c0_19 = arith.constant 0 : index
    %c0_20 = arith.constant 0 : index
    %c0_21 = arith.constant 0 : index
    %14 = vector.load %arg8[%c0_18, %c0_19, %c0_20, %c0_21] : memref<1x1x2x128xf32, #tpu.memory_space<vmem>>, vector<1x1x2x128xf32>
    %15 = arith.addf %8, %9 : vector<1x1x2x128xf32>
    %16 = arith.addf %14, %15 : vector<1x1x2x128xf32>
    %c0_22 = arith.constant 0 : index
    %c0_23 = arith.constant 0 : index
    %c0_24 = arith.constant 0 : index
    %c0_25 = arith.constant 0 : index
    %17 = vector.load %arg8[%c0_22, %c0_23, %c0_24, %c0_25] : memref<1x1x2x128xf32, #tpu.memory_space<vmem>>, vector<1x1x2x128xf32>
    tpu.vector_store %arg8[%c0_22, %c0_23, %c0_24, %c0_25], %16 {strides = array<i32>} : memref<1x1x2x128xf32, #tpu.memory_space<vmem>>, vector<1x1x2x128xf32>,
    %18 = arith.extui %5 : i1 to i32
    %c0_i32_26 = arith.constant 0 : i32
    %19 = arith.cmpi ne, %18, %c0_i32_26 : i32
    scf.if %19 {
      %c0_27 = arith.constant 0 : index
      %c0_28 = arith.constant 0 : index
      %c0_29 = arith.constant 0 : index
      %c0_30 = arith.constant 0 : index
      %20 = vector.load %arg7[%c0_27, %c0_28, %c0_29, %c0_30] : memref<1x1x2x128xf32, #tpu.memory_space<vmem>>, vector<1x1x2x128xf32>
      %21 = vector.shape_cast %20 : vector<1x1x2x128xf32> to vector<1x1x1x2x128xf32>
      %cst = arith.constant dense<0.000000e+00> : vector<1xf32>
      %22 = vector.multi_reduction <add>, %21, %cst [1, 2, 3, 4] : vector<1x1x1x2x128xf32> to vector<1xf32>
      %23 = vector.shape_cast %22 : vector<1xf32> to vector<1x1x1x1x1xf32>
      %24 = vector.extract %23[0, 0, 0, 0, 0] : f32 from vector<1x1x1x1x1xf32>
      %c0_31 = arith.constant 0 : index
      %c0_32 = arith.constant 0 : index
      %c0_33 = arith.constant 0 : index
      %c0_34 = arith.constant 0 : index
      %25 = vector.load %arg8[%c0_31, %c0_32, %c0_33, %c0_34] : memref<1x1x2x128xf32, #tpu.memory_space<vmem>>, vector<1x1x2x128xf32>
      %26 = vector.shape_cast %25 : vector<1x1x2x128xf32> to vector<1x1x1x2x128xf32>
      %cst_35 = arith.constant dense<0.000000e+00> : vector<1xf32>
      %27 = vector.multi_reduction <add>, %26, %cst_35 [1, 2, 3, 4] : vector<1x1x1x2x128xf32> to vector<1xf32>
      %28 = vector.shape_cast %27 : vector<1xf32> to vector<1x1x1x1x1xf32>
      %29 = vector.extract %28[0, 0, 0, 0, 0] : f32 from vector<1x1x1x1x1xf32>
      %cst_36 = arith.constant 2.000000e+00 : f32
      %30 = arith.mulf %cst_36, %24 : f32
      %cst_37 = arith.constant 1.000000e+00 : f32
      %31 = arith.addf %30, %cst_37 : f32
      %cst_38 = arith.constant 1.000000e+00 : f32
      %32 = arith.addf %29, %cst_38 : f32
      %33 = arith.divf %31, %32 : f32
      %cst_39 = arith.constant 1.000000e+00 : f32
      %34 = arith.subf %cst_39, %33 : f32
      %35 = vector.broadcast %34 : f32 to vector<1x8x128xf32>
      %c0_40 = arith.constant 0 : index
      %c0_41 = arith.constant 0 : index
      %c0_42 = arith.constant 0 : index
      %36 = vector.load %arg6[%c0_40, %c0_41, %c0_42] : memref<1x8x128xf32, #tpu.memory_space<vmem>>, vector<1x8x128xf32>
      tpu.vector_store %arg6[%c0_40, %c0_41, %c0_42], %35 {strides = array<i32>} : memref<1x8x128xf32, #tpu.memory_space<vmem>>, vector<1x8x128xf32>,
    } else {
    }
    return
  }
  func.func @transform_0(%arg0: i32, %arg1: i32, %arg2: i32, %arg3: memref<4xi32, #tpu.memory_space<smem>>) -> (i32, i32, i32, i32) {
    %0 = arith.index_cast %arg0 : i32 to index
    %1 = memref.load %arg3[%0] : memref<4xi32, #tpu.memory_space<smem>>
    %c0_i32 = arith.constant 0 : i32
    %c0_i32_0 = arith.constant 0 : i32
    return %arg1, %1, %arg2, %c0_i32 : i32, i32, i32, i32
  }
  func.func @transform_1(%arg0: i32, %arg1: i32, %arg2: i32, %arg3: memref<4xi32, #tpu.memory_space<smem>>) -> (i32, i32, i32, i32) {
    %0 = arith.index_cast %arg0 : i32 to index
    %1 = memref.load %arg3[%0] : memref<4xi32, #tpu.memory_space<smem>>
    %c0_i32 = arith.constant 0 : i32
    %c0_i32_0 = arith.constant 0 : i32
    return %arg1, %1, %arg2, %c0_i32 : i32, i32, i32, i32
  }
  func.func @transform_2(%arg0: i32, %arg1: i32, %arg2: i32, %arg3: memref<4xi32, #tpu.memory_space<smem>>) -> (i32, i32, i32) {
    %c0_i32 = arith.constant 0 : i32
    %c0_i32_0 = arith.constant 0 : i32
    %c0_i32_1 = arith.constant 0 : i32
    return %arg0, %c0_i32, %c0_i32_0 : i32, i32, i32
  }
}

</mosaic_0001>

<bundles_post_ra>
// kernel: soft_dice_loss.1
= control target key start
LH: loop header
LB: loop body
LE: loop exit
PB: predicated region body
PF: predicated region fallthrough
CT: control target
= control target key end

     0   :  { %s534_s15 = smov [#allocation5]   ;;  %s626_s0 = inlined_call_operand.vmem [shape: s32[4], index: 0, kind: input, shape index: {}]   ;;  %s627_s1 = inlined_call_operand.vmem [shape: f32[2,4,2,128], index: 1, kind: input, shape index: {}]   ;;  %s628_s2 = inlined_call_operand.vmem [shape: f32[2,4,2,128], index: 2, kind: input, shape index: {}]   ;;  %s629_s3 = inlined_call_operand.vmem [shape: f32[4,8,128], index: 3, kind: output, shape index: {}]  }
   0x1   :  { %s9_s14 = sshll.u32 %s626_s0, 4  ;;  %s10_s14 = int_to_ptr.vmem [resolvable:$true] %s9_s14 }
   0x2   :  { %12 = dma.vmem_to_smem %s10_s14, 16, %s534_s15, [#allocation4] }
   0x3   :  { %512 = dma.done.wait [#allocation4], 16 }
   0x4   :  { %513 = vsyncadd [#allocation4], 4294967280 }
   0x5   :  { %15 = sfence }
   0x6   :  { %s559_s16 = smov 0   ;;  %s561_s17 = smov 0  }
   0x7   :  { %s563_s18 = smov 0   ;;  %s565_s19 = smov 0  }
   0x8   :  { %s567_s20 = smov 0  }
   0x9 LB: > { %s36_s0 = sadd.s32 1, %s524_s18  ;;  %s40_s21 = sadd.s32 1, %s528_s19  ;;  %s532_s20 = sphi %s567_s20, %s21_s20   ;;  %s528_s19 = sphi %s565_s19, %s633_s19   ;;  %s524_s18 = sphi %s563_s18, %s632_s18   ;;  %s520_s17 = sphi %s561_s17, %s631_s17   ;;  %s516_s16 = sphi %s559_s16, %s630_s16  }
   0xa   : > { %p38_p0 = scmp.ge.s32.totalorder %s36_s0, 2  ;;  %p418_p1 = scmp.ge.s32.totalorder %s532_s20, 1 }
   0xb   : > { %p178_p2 = scmp.lt.s32.totalorder %s532_s20, 9 }
   0xc   : > { %s635_s0 = smov (%p38_p0, %s36_s0), 0  ;;  %s637_s21 = smov (!%p38_p0, %s40_s21), %s528_s19 }
   0xd   : > { %p179_p3 = pnand %p418_p1, %p178_p2  ;;  %p42_p4 = scmp.ge.s32.totalorder %s637_s21, 4 }
   0xe   : > { %s218_s22 = sld [smem:[#allocation5 + %s520_s17]] (!%p179_p3)  ;;  %p219_p5 = scmp.lt.s32.totalorder (!%p179_p3), %s516_s16, 1 }
   0xf   : > { %s639_s21 = smov (%p42_p4, %s637_s21), 0  ;;  %182 = sbr.rel (%p179_p3) target bundleno = 306 (0x132), region = 28 }
  0x10   : > { %s231_s23 = sld [smem:[#allocation5 + %s520_s17]] (!%p179_p3)  ;;  %p244_p6 = scmp.lt.s32.totalorder (!%p179_p3), %s520_s17, 3 }
  0x11   : > { %p248_p7 = scmp.eq.s32.totalorder (!%p179_p3), %s516_s16, 0  ;;  %p252_p8 = scmp.eq.s32.totalorder (!%p179_p3), %s516_s16, 1 }
  0x14   : > { %s220_s24 = scalar_select %p219_p5, %s516_s16, 1  ;;  %v535_v0 = vmov (%p248_p7), 0.0  }
  0x15   : > { %s641_s17 = smov (!%p244_p6, %s520_s17), 3  ;;  %p221_p9 = scmp.lt.s32.totalorder %s218_s22, 3  ;;  %257 = vst [vmem:[#allocation2] sm:$0x3] (%p248_p7), %v535_v0 }
  0x16   : > { %s423_s25 = sshll.u32 %s641_s17, 3  ;;  %s419_s29 = sshll.u32 %s220_s24, 2  ;;  %258 = vst [vmem:[#allocation3] sm:$0x3] (%p248_p7), %v535_v0 }
  0x17   : > { %s598_s28 = scalar_lea.vmem %s629_s3, %s423_s25  ;;  %p234_p10 = scmp.lt.s32.totalorder %s231_s23, 3 }
  0x18   : > { %s643_s22 = smov (!%p221_p9, %s218_s22), 3  ;;  %256 = sbr.rel (!%p248_p7) target bundleno = 29 (0x1d), region = 32 }
  0x19   : > { %s645_s23 = smov (!%p234_p10, %s231_s23), 3  ;;  %s227_s30 = sadd.s32 %s419_s29, %s643_s22 }
  0x1a   : > { %s420_s4 = sshll.u32 %s227_s30, 1  ;;  %s240_s5 = sadd.s32 %s419_s29, %s645_s23 }
  0x1b   : > { %s229_s8 = scalar_lea.vmem %s627_s1, %s420_s4  ;;  %s422_s9 = sshll.u32 %s240_s5, 1 }
  0x1c   : > { %s242_s12 = scalar_lea.vmem %s628_s2, %s422_s9 }
  0x1d PF: > { %v259_v1 = vld [vmem:[%s229_s8] sm:$0x3]  ;;  %v265_v5 = vld [vmem:[#allocation3] sm:$0x3]  ;;  %vm272_vm0 = vcmask (%p252_p8), 1041408  }
  0x1e   : > { %v260_v2 = vld [vmem:[%s242_s12] sm:$0x3] }
  0x1f   : > { %v261_v3 = vld [vmem:[#allocation2] sm:$0x3]  ;;  %v262_v4 = vmul.f32 %v260_v2, %v259_v1  ;;  %v266_v6 = vadd.f32 %v260_v2, %v259_v1 }
  0x20   : > { %270 = sbr.rel (!%p252_p8) target bundleno = 306 (0x132), region = 36 }
  0x21   : > { %v263_v7 = vadd.f32 %v262_v4, %v261_v3  ;;  %v267_v8 = vadd.f32 %v266_v6, %v265_v5 }
  0x23   : > { %264 = vst [vmem:[#allocation2] sm:$0x3] %v263_v7 }
  0x24   : > { %268 = vst [vmem:[#allocation3] sm:$0x3] %v267_v8 }
  0x2a   : > { %v271_v9 = vld [vmem:[#allocation2] sm:$0x3] }
  0x2b   : > { %v273_v10 = vsel %vm272_vm0, %v271_v9, 0.0  ;;  %v283_v11 = vld [vmem:[#allocation3] sm:$0x3] }
  0x2c   : > { %274 = vadd.xlane.f32.xlu0 %v273_v10  ;;  %v284_v12 = vsel %vm272_vm0, %v283_v11, 0.0 }
  0x34   : > { %285 = vadd.xlane.f32.xlu0 %v284_v12 }
  0x9f   : > { %v275_v13 = vpop.xlane.xlu0 %274 }
  0xa0   : > { %v276_v14 = vrot.slane %v275_v13, 4 }
  0xa2   : > { %v277_v15 = vadd.f32 %v276_v14, %v275_v13 }
  0xa4   : > { %v278_v16 = vrot.slane %v277_v15, 2 }
  0xa6   : > { %v279_v17 = vadd.f32 %v278_v16, %v277_v15 }
  0xa7   : > { %v286_v18 = vpop.xlane.xlu0 %285 }
  0xa8   : > { %v287_v19 = vrot.slane %v286_v18, 4  ;;  %v280_v20 = vrot.slane %v279_v17, 1 }
  0xaa   : > { %v288_v21 = vadd.f32 %v287_v19, %v286_v18  ;;  %v281_v22 = vadd.f32 %v280_v20, %v279_v17 }
  0xac   : > { %v289_v23 = vrot.slane %v288_v21, 2  ;;  %430 = vpush %v281_v22 }
  0xae   : > { %v290_v24 = vadd.f32 %v289_v23, %v288_v21 }
  0xb0   : > { %v291_v25 = vrot.slane %v290_v24, 1 }
  0xb2   : > { %v292_v26 = vadd.f32 %v291_v25, %v290_v24 }
  0xb4   : > { %432 = vpush %v292_v26 }
  0xdd   : > { %s431_s13 = spop %430 }
  0xde   : > { %s294_s16 = smul.f32 2.0, %s431_s13 }
  0xe0   : > { %s295_s17 = sadd.f32 1.0, %s294_s16 }
  0xe5   : > { %s433_s14 = spop %432 }
  0xe6   : > { %s296_s15 = sadd.f32 1.0, %s433_s14 }
  0xe8   : > { %v297_v27 = vstv %s296_s15 }
  0xe9   : > { %478 = vrcp.f32 %v297_v27  ;;  %v309_v31 = vand.u32 2147483648, %v297_v27  ;;  %v307_v33 = vand.u32 2147483647, %v297_v27  ;;  %vm303_vm2 = vweird.f32 %v297_v27 }
  0xeb   : > { %v310_v35 = vor.u32 1.1754944e-38, %v309_v31  ;;  %vm308_vm4 = vcmp.eq.f32.partialorder %v307_v33, 8.507059e+37 }
  0xef   : > { %v479_v28 = vpop.eup %478 }
  0xf0   : > { %v299_v29 = vmul.f32 %v479_v28, %v297_v27  ;;  %vm304_vm1 = vweird.f32 %v479_v28 }
  0xf1   : > { %vm305_vm3 = vmor %vm303_vm2, %vm304_vm1 }
  0xf2   : > { %v300_v30 = vsub.f32 1.0, %v299_v29 }
  0xf4   : > { %v301_v32 = vmul.f32 %v479_v28, %v300_v30 }
  0xf6   : > { %v302_v34 = vadd.f32 %v479_v28, %v301_v32 }
  0xf8   : > { %v306_v36 = vsel %vm305_vm3, %v479_v28, %v302_v34 }
  0xf9   : > { %v311_v37 = vsel %vm308_vm4, %v310_v35, %v306_v36 }
  0xfa   : > { %434 = vpush %v311_v37 }
 0x12b   : > { %s435_s22 = spop %434 }
 0x12c   : > { %s313_s23 = smul.f32 %s435_s22, %s295_s17 }
 0x12e   : > { %s314_s24 = ssub.f32 1.0, %s313_s23 }
 0x130   : > { %v315_v38 = vstv %s314_s24 }
 0x131   : > { %316 = vst [vmem:[%s598_s28] sm:$0xff] %v315_v38 }
 0x132 PF: > { %s21_s20 = sadd.s32 1, %s532_s20   ;;  %s630_s16 = smov %s524_s18 }
 0x133   : > { %p18_p11 = scmp.ge.s32.totalorder %s21_s20, 10   ;;  %s631_s17 = smov %s528_s19 }
 0x134   : > { %s632_s18 = smov %s635_s0  ;;  %s633_s19 = smov %s639_s21 }
 0x135   :  { %20 = sbr.rel (!%p18_p11) target bundleno = 9 (0x9), region = 69 }

</bundles_post_ra>
